<compile_context>
chip_gen: v6e
topology: v6e:2x2x1
jax: 0.10.0
libtpu: 0.0.40
codegen_flags: <defaults>
</compile_context>

<pallas_src>
import math

import jax
import jax.numpy as jnp
from jax.experimental import pallas as pl
from jax.experimental.pallas import tpu as pltpu

LANE = 128     # last-dim vreg lanes
SUBLANE = 8    # second-to-last-dim sublanes (f32)


def _round_up(n: int, m: int) -> int:
    return ((n + m - 1) // m) * m


def _rmm_kernel(x_ref, w1m_ref, b1m_ref, w2s_ref, w1b_ref, b1b_ref,
                w2b_ref, b2b_ref, out_ref):
    """One batch tile of RMMPolicyNet.forward.

    w1m = [W1a | W2a[:S]]  (padded, bf16)   -> one merged K=S matmul
    w2s = W2a[S:]          (padded, bf16)   -> applied to a1
    Hidden/action lane dims are 128-padded; padded weight rows/cols and padded
    bias lanes are exactly zero, so padding never leaks into valid columns.
    """
    hp = w1b_ref.shape[0]          # padded hidden dim (multiple of 128)
    ap = w1b_ref.shape[1]          # padded action dim (multiple of 128)

    x = x_ref[...].astype(w1m_ref.dtype)                        # [TB, S] bf16

    # --- merged first layer: one 2*Hp-wide MXU pass -------------------------
    h12 = jnp.dot(x, w1m_ref[...], preferred_element_type=jnp.float32)
    h12 = h12 + b1m_ref[...]                                    # [TB, 2*Hp] f32

    # --- branch 1: a1 = sigmoid(Linear(ReLU(Linear(x)))) --------------------
    h1 = jnp.maximum(h12[:, :hp], 0.0)                          # 128-aligned slice
    l1 = jnp.dot(h1.astype(w1b_ref.dtype), w1b_ref[...],
                 preferred_element_type=jnp.float32) + b1b_ref[...]
    # sigmoid = recip(1 + exp(-l1)); exp + approx-recip both run on the EUP.
    a1 = pl.reciprocal(1.0 + jnp.exp(-l1), approx=True)         # f32 [TB, Ap]
    # Padded lanes of a1 hold ~sigmoid(0)=0.5; they only ever multiply the
    # zero-padded rows of w2s and are sliced off in the wrapper -> no leakage.

    # --- branch 2: a2 = tanh(Linear(ReLU(Linear(cat[x, a1])))) --------------
    # cat([x, a1]) @ W2a == x @ W2a[:S] (already in h12[:, hp:]) + a1 @ W2a[S:]
    h2 = h12[:, hp:] + jnp.dot(a1.astype(w2s_ref.dtype), w2s_ref[...],
                               preferred_element_type=jnp.float32)
    h2 = jnp.maximum(h2, 0.0)                                   # f32 [TB, Hp]
    l2 = jnp.dot(h2.astype(w2b_ref.dtype), w2b_ref[...],
                 preferred_element_type=jnp.float32) + b2b_ref[...]
    a2 = jnp.tanh(l2)

    # Single combined output tile: a1 -> lanes [0, Ap), a2 -> lanes [Ap, 2*Ap).
    # Both stores are 128-aligned and lane-dense (unmasked vst).
    out_ref[:, :ap] = a1.astype(out_ref.dtype)
    out_ref[:, ap:] = a2.astype(out_ref.dtype)


def init_params(key, state_dim, hidden_dim, action_dim, dtype=jnp.float32):
    """PyTorch nn.Linear default init (U(+-1/sqrt(fan_in))); weights stored [in, out]."""
    ks = jax.random.split(key, 8)

    def linear(kw, kb, fan_in, fan_out):
        bound = 1.0 / math.sqrt(fan_in)
        w = jax.random.uniform(kw, (fan_in, fan_out), dtype, -bound, bound)
        b = jax.random.uniform(kb, (1, fan_out), dtype, -bound, bound)
        return w, b

    w1a, b1a = linear(ks[0], ks[1], state_dim, hidden_dim)
    w1b, b1b = linear(ks[2], ks[3], hidden_dim, action_dim)
    w2a, b2a = linear(ks[4], ks[5], state_dim + action_dim, hidden_dim)
    w2b, b2b = linear(ks[6], ks[7], hidden_dim, action_dim)
    return dict(w1a=w1a, b1a=b1a, w1b=w1b, b1b=b1b,
                w2a=w2a, b2a=b2a, w2b=w2b, b2b=b2b)


def prepare_params(params, state_dim, hidden_dim, action_dim,
                   weight_dtype=jnp.bfloat16):
    """One-time (outside the hot path) packing of weights for the kernel.

    * Hidden/action lane dims are zero-padded to multiples of 128.
    * W1a and W2a[:state_dim] are merged column-wise into one [S, 2*Hp] weight
      (one MXU pass per tile); their biases are merged the same way.
    * W2a[state_dim:] (the a1 rows) is kept separate so the kernel never
      concatenates features.
    * Matmul operands are bf16; biases stay f32.
    """
    hp = _round_up(hidden_dim, LANE)
    ap = _round_up(action_dim, LANE)

    def pad(a, rows, cols, dtype):
        out = jnp.zeros((rows, cols), dtype)
        return out.at[:a.shape[0], :a.shape[1]].set(a.astype(dtype))

    w1a = pad(params["w1a"], state_dim, hp, weight_dtype)            # [S, Hp]
    w2x = pad(params["w2a"][:state_dim], state_dim, hp, weight_dtype)  # [S, Hp]
    w1m = jnp.concatenate([w1a, w2x], axis=1)                        # [S, 2*Hp]
    b1m = jnp.concatenate([pad(params["b1a"], 1, hp, jnp.float32),
                           pad(params["b2a"], 1, hp, jnp.float32)], axis=1)

    return dict(
        w1m=w1m,
        b1m=b1m,
        w2s=pad(params["w2a"][state_dim:], ap, hp, weight_dtype),    # [Ap, Hp]
        w1b=pad(params["w1b"], hp, ap, weight_dtype),
        b1b=pad(params["b1b"], 1, ap, jnp.float32),
        w2b=pad(params["w2b"], hp, ap, weight_dtype),
        b2b=pad(params["b2b"], 1, ap, jnp.float32),
    )


def _pick_batch_tile(B, block_b):
    """Batch tile: large (overhead amortization) but always an even grid for
    B > SUBLANE so both v7x TensorCores get work; v5e/v6e just see fewer steps."""
    if B <= SUBLANE:
        return B
    n_tiles = max(2, pl.cdiv(B, block_b))
    if n_tiles % 2:
        n_tiles += 1
    tb = _round_up(pl.cdiv(B, n_tiles), SUBLANE)
    return min(tb, _round_up(B, SUBLANE))


def rmm_policy_net(x, prepped, state_dim, hidden_dim, action_dim, *,
                   block_b=512):
    """Pallas forward of RMMPolicyNet. x: [B, state_dim] f32 -> [B, 2*action_dim] f32."""
    B, S = x.shape
    assert S == state_dim
    hp2 = prepped["w1m"].shape[1]          # 2*Hp
    ap = prepped["w1b"].shape[1]           # padded action dim

    tb = _pick_batch_tile(B, block_b)
    grid = (pl.cdiv(B, tb),)

    resident = lambda shape: pl.BlockSpec(shape, lambda i: (0, 0))

    flops = 2 * B * (state_dim * hp2 + 3 * (hp2 // 2) * ap)
    bytes_accessed = (x.size * x.dtype.itemsize
                      + sum(int(v.size) * v.dtype.itemsize
                            for v in prepped.values())
                      + B * 2 * ap * 2)                       # bf16 output
    cost = pl.CostEstimate(flops=int(flops),
                           transcendentals=int(3 * B * ap),
                           bytes_accessed=int(bytes_accessed))

    out = pl.pallas_call(
        _rmm_kernel,
        out_shape=jax.ShapeDtypeStruct((B, 2 * ap), jnp.bfloat16),
        grid=grid,
        in_specs=[
            pl.BlockSpec((tb, state_dim), lambda i: (i, 0)),          # x (natural shape)
            resident(prepped["w1m"].shape), resident(prepped["b1m"].shape),
            resident(prepped["w2s"].shape),
            resident(prepped["w1b"].shape), resident(prepped["b1b"].shape),
            resident(prepped["w2b"].shape), resident(prepped["b2b"].shape),
        ],
        out_specs=pl.BlockSpec((tb, 2 * ap), lambda i: (i, 0)),
        compiler_params=pltpu.CompilerParams(
            dimension_semantics=("parallel",)),
        cost_estimate=cost,
    )(x, prepped["w1m"], prepped["b1m"], prepped["w2s"],
      prepped["w1b"], prepped["b1b"], prepped["w2b"], prepped["b2b"])

    # Drop lane padding and concatenate exactly like the PyTorch module.
    a1 = out[:, :action_dim]
    a2 = out[:, ap:ap + action_dim]
    return jnp.concatenate([a1, a2], axis=1).astype(jnp.float32)


def rmm_policy_net_ref(x, params):
    """Pure-JAX f32 reference matching the PyTorch forward."""
    h1 = jnp.maximum(x @ params["w1a"] + params["b1a"], 0.0)
    a1 = jax.nn.sigmoid(h1 @ params["w1b"] + params["b1b"])
    xc = jnp.concatenate([x, a1], axis=1)
    h2 = jnp.maximum(xc @ params["w2a"] + params["b2a"], 0.0)
    a2 = jnp.tanh(h2 @ params["w2b"] + params["b2b"])
    return jnp.concatenate([a1, a2], axis=1)


if __name__ == "__main__":
    # Small shapes consistent with the DDPG actor; batch large enough to give
    # an even 2-step batch grid (128 rows per tile).
    batch, state_dim, hidden_dim, action_dim = 256, 16, 32, 8

    key = jax.random.PRNGKey(0)
    kx, kp = jax.random.split(key)
    x = jax.random.normal(kx, (batch, state_dim), jnp.float32)

    params = init_params(kp, state_dim, hidden_dim, action_dim)
    prepped = prepare_params(params, state_dim, hidden_dim, action_dim)

    fwd = jax.jit(lambda xx, pp: rmm_policy_net(
        xx, pp, state_dim, hidden_dim, action_dim, block_b=512))

    out = jax.block_until_ready(fwd(x, prepped))
    ref = rmm_policy_net_ref(x, params)

    assert out.shape == (batch, 2 * action_dim)
    # bf16 matmul operands / bf16 output / approx-EUP sigmoid vs pure-f32 ref.
    assert jnp.allclose(out, ref, atol=5e-2, rtol=5e-2), \
        float(jnp.max(jnp.abs(out - ref)))
    print("KERNEL_OK")
</pallas_src>

<mosaic_0001>
module attributes {stable_mosaic.version = 11 : i64} {
  func.func @_rmm_kernel(%arg0: i32, %arg1: memref<128x16xf32, #tpu.memory_space<vmem>>, %arg2: memref<16x256xbf16, #tpu.memory_space<vmem>>, %arg3: memref<1x256xf32, #tpu.memory_space<vmem>>, %arg4: memref<128x128xbf16, #tpu.memory_space<vmem>>, %arg5: memref<128x128xbf16, #tpu.memory_space<vmem>>, %arg6: memref<1x128xf32, #tpu.memory_space<vmem>>, %arg7: memref<128x128xbf16, #tpu.memory_space<vmem>>, %arg8: memref<1x128xf32, #tpu.memory_space<vmem>>, %arg9: memref<128x256xbf16, #tpu.memory_space<vmem>>) attributes {dimension_semantics = [#tpu.dimension_semantics<parallel>], iteration_bounds = array<i64: 2>, scalar_prefetch = 0 : i64, scratch_operands = 0 : i64, tpu.core_type = #tpu.core_type<tc>, window_params = [{transform_indices = @transform_0, window_bounds = array<i64: 128, 16>}, {pipeline_mode = #tpu.pipeline_mode<synchronous>, transform_indices = @transform_1, window_bounds = array<i64: 16, 256>}, {pipeline_mode = #tpu.pipeline_mode<synchronous>, transform_indices = @transform_2, window_bounds = array<i64: 1, 256>}, {pipeline_mode = #tpu.pipeline_mode<synchronous>, transform_indices = @transform_3, window_bounds = array<i64: 128, 128>}, {pipeline_mode = #tpu.pipeline_mode<synchronous>, transform_indices = @transform_4, window_bounds = array<i64: 128, 128>}, {pipeline_mode = #tpu.pipeline_mode<synchronous>, transform_indices = @transform_5, window_bounds = array<i64: 1, 128>}, {pipeline_mode = #tpu.pipeline_mode<synchronous>, transform_indices = @transform_6, window_bounds = array<i64: 128, 128>}, {pipeline_mode = #tpu.pipeline_mode<synchronous>, transform_indices = @transform_7, window_bounds = array<i64: 1, 128>}, {transform_indices = @transform_8, window_bounds = array<i64: 128, 256>}]} {
    %c0 = arith.constant 0 : index
    %c0_0 = arith.constant 0 : index
    %0 = vector.load %arg1[%c0, %c0_0] : memref<128x16xf32, #tpu.memory_space<vmem>>, vector<128x16xf32>
    %1 = arith.truncf %0 : vector<128x16xf32> to vector<128x16xbf16>
    %c0_1 = arith.constant 0 : index
    %c0_2 = arith.constant 0 : index
    %2 = vector.load %arg2[%c0_1, %c0_2] : memref<16x256xbf16, #tpu.memory_space<vmem>>, vector<16x256xbf16>
    %cst = arith.constant dense<0.000000e+00> : vector<128x256xf32>
    %3 = tpu.matmul %1, %2, %cst {dimension_numbers = #tpu.dot_dimension_numbers<[1], [0], [0], [1], [0, 0, 1, 1], [], []>} : vector<128x16xbf16>, vector<16x256xbf16>, vector<128x256xf32> -> vector<128x256xf32>
    %c0_3 = arith.constant 0 : index
    %c0_4 = arith.constant 0 : index
    %4 = vector.load %arg3[%c0_3, %c0_4] : memref<1x256xf32, #tpu.memory_space<vmem>>, vector<1x256xf32>
    %5 = vector.broadcast %4 : vector<1x256xf32> to vector<128x256xf32>
    %6 = arith.addf %3, %5 : vector<128x256xf32>
    %7 = vector.extract_strided_slice %6 {offsets = [0, 0], sizes = [128, 128], strides = [1, 1]} : vector<128x256xf32> to vector<128x128xf32>
    %cst_5 = arith.constant 0.000000e+00 : f32
    %8 = vector.broadcast %cst_5 : f32 to vector<128x128xf32>
    %9 = arith.maximumf %7, %8 : vector<128x128xf32>
    %10 = arith.truncf %9 : vector<128x128xf32> to vector<128x128xbf16>
    %c0_6 = arith.constant 0 : index
    %c0_7 = arith.constant 0 : index
    %11 = vector.load %arg5[%c0_6, %c0_7] : memref<128x128xbf16, #tpu.memory_space<vmem>>, vector<128x128xbf16>
    %cst_8 = arith.constant dense<0.000000e+00> : vector<128x128xf32>
    %12 = tpu.matmul %10, %11, %cst_8 {dimension_numbers = #tpu.dot_dimension_numbers<[1], [0], [0], [1], [0, 0, 1, 1], [], []>} : vector<128x128xbf16>, vector<128x128xbf16>, vector<128x128xf32> -> vector<128x128xf32>
    %c0_9 = arith.constant 0 : index
    %c0_10 = arith.constant 0 : index
    %13 = vector.load %arg6[%c0_9, %c0_10] : memref<1x128xf32, #tpu.memory_space<vmem>>, vector<1x128xf32>
    %14 = vector.broadcast %13 : vector<1x128xf32> to vector<128x128xf32>
    %15 = arith.addf %12, %14 : vector<128x128xf32>
    %cst_11 = arith.constant 0.000000e+00 : f32
    %16 = vector.broadcast %cst_11 : f32 to vector<128x128xf32>
    %17 = arith.subf %16, %15 : vector<128x128xf32>
    %18 = math.exp %17 : vector<128x128xf32>
    %cst_12 = arith.constant 1.000000e+00 : f32
    %19 = vector.broadcast %cst_12 : f32 to vector<128x128xf32>
    %20 = arith.addf %19, %18 : vector<128x128xf32>
    %21 = tpu.reciprocal %20 {approx = true} : vector<128x128xf32> -> vector<128x128xf32>
    %22 = vector.extract_strided_slice %6 {offsets = [0, 128], sizes = [128, 128], strides = [1, 1]} : vector<128x256xf32> to vector<128x128xf32>
    %23 = arith.truncf %21 : vector<128x128xf32> to vector<128x128xbf16>
    %c0_13 = arith.constant 0 : index
    %c0_14 = arith.constant 0 : index
    %24 = vector.load %arg4[%c0_13, %c0_14] : memref<128x128xbf16, #tpu.memory_space<vmem>>, vector<128x128xbf16>
    %cst_15 = arith.constant dense<0.000000e+00> : vector<128x128xf32>
    %25 = tpu.matmul %23, %24, %cst_15 {dimension_numbers = #tpu.dot_dimension_numbers<[1], [0], [0], [1], [0, 0, 1, 1], [], []>} : vector<128x128xbf16>, vector<128x128xbf16>, vector<128x128xf32> -> vector<128x128xf32>
    %26 = arith.addf %22, %25 : vector<128x128xf32>
    %cst_16 = arith.constant 0.000000e+00 : f32
    %27 = vector.broadcast %cst_16 : f32 to vector<128x128xf32>
    %28 = arith.maximumf %26, %27 : vector<128x128xf32>
    %29 = arith.truncf %28 : vector<128x128xf32> to vector<128x128xbf16>
    %c0_17 = arith.constant 0 : index
    %c0_18 = arith.constant 0 : index
    %30 = vector.load %arg7[%c0_17, %c0_18] : memref<128x128xbf16, #tpu.memory_space<vmem>>, vector<128x128xbf16>
    %cst_19 = arith.constant dense<0.000000e+00> : vector<128x128xf32>
    %31 = tpu.matmul %29, %30, %cst_19 {dimension_numbers = #tpu.dot_dimension_numbers<[1], [0], [0], [1], [0, 0, 1, 1], [], []>} : vector<128x128xbf16>, vector<128x128xbf16>, vector<128x128xf32> -> vector<128x128xf32>
    %c0_20 = arith.constant 0 : index
    %c0_21 = arith.constant 0 : index
    %32 = vector.load %arg8[%c0_20, %c0_21] : memref<1x128xf32, #tpu.memory_space<vmem>>, vector<1x128xf32>
    %33 = vector.broadcast %32 : vector<1x128xf32> to vector<128x128xf32>
    %34 = arith.addf %31, %33 : vector<128x128xf32>
    %35 = math.tanh %34 : vector<128x128xf32>
    %36 = arith.truncf %21 : vector<128x128xf32> to vector<128x128xbf16>
    %c0_22 = arith.constant 0 : index
    %c0_23 = arith.constant 0 : index
    %37 = vector.load %arg9[%c0_22, %c0_23] : memref<128x256xbf16, #tpu.memory_space<vmem>>, vector<128x128xbf16>
    tpu.vector_store %arg9[%c0_22, %c0_23], %36 {strides = array<i32>} : memref<128x256xbf16, #tpu.memory_space<vmem>>, vector<128x128xbf16>,
    %38 = arith.truncf %35 : vector<128x128xf32> to vector<128x128xbf16>
    %c0_24 = arith.constant 0 : index
    %c128 = arith.constant 128 : index
    %39 = vector.load %arg9[%c0_24, %c128] : memref<128x256xbf16, #tpu.memory_space<vmem>>, vector<128x128xbf16>
    tpu.vector_store %arg9[%c0_24, %c128], %38 {strides = array<i32>} : memref<128x256xbf16, #tpu.memory_space<vmem>>, vector<128x128xbf16>,
    return
  }
  func.func @transform_0(%arg0: i32) -> (i32, i32) {
    %c0_i32 = arith.constant 0 : i32
    %c0_i32_0 = arith.constant 0 : i32
    return %arg0, %c0_i32 : i32, i32
  }
  func.func @transform_1(%arg0: i32) -> (i32, i32) {
    %c0_i32 = arith.constant 0 : i32
    %c0_i32_0 = arith.constant 0 : i32
    %c0_i32_1 = arith.constant 0 : i32
    return %c0_i32, %c0_i32_0 : i32, i32
  }
  func.func @transform_2(%arg0: i32) -> (i32, i32) {
    %c0_i32 = arith.constant 0 : i32
    %c0_i32_0 = arith.constant 0 : i32
    %c0_i32_1 = arith.constant 0 : i32
    return %c0_i32, %c0_i32_0 : i32, i32
  }
  func.func @transform_3(%arg0: i32) -> (i32, i32) {
    %c0_i32 = arith.constant 0 : i32
    %c0_i32_0 = arith.constant 0 : i32
    %c0_i32_1 = arith.constant 0 : i32
    return %c0_i32, %c0_i32_0 : i32, i32
  }
  func.func @transform_4(%arg0: i32) -> (i32, i32) {
    %c0_i32 = arith.constant 0 : i32
    %c0_i32_0 = arith.constant 0 : i32
    %c0_i32_1 = arith.constant 0 : i32
    return %c0_i32, %c0_i32_0 : i32, i32
  }
  func.func @transform_5(%arg0: i32) -> (i32, i32) {
    %c0_i32 = arith.constant 0 : i32
    %c0_i32_0 = arith.constant 0 : i32
    %c0_i32_1 = arith.constant 0 : i32
    return %c0_i32, %c0_i32_0 : i32, i32
  }
  func.func @transform_6(%arg0: i32) -> (i32, i32) {
    %c0_i32 = arith.constant 0 : i32
    %c0_i32_0 = arith.constant 0 : i32
    %c0_i32_1 = arith.constant 0 : i32
    return %c0_i32, %c0_i32_0 : i32, i32
  }
  func.func @transform_7(%arg0: i32) -> (i32, i32) {
    %c0_i32 = arith.constant 0 : i32
    %c0_i32_0 = arith.constant 0 : i32
    %c0_i32_1 = arith.constant 0 : i32
    return %c0_i32, %c0_i32_0 : i32, i32
  }
  func.func @transform_8(%arg0: i32) -> (i32, i32) {
    %c0_i32 = arith.constant 0 : i32
    %c0_i32_0 = arith.constant 0 : i32
    return %arg0, %c0_i32 : i32, i32
  }
}

</mosaic_0001>

<bundles_post_ra>
// kernel: _lambda_.1
= control target key start
LH: loop header
LB: loop body
LE: loop exit
PB: predicated region body
PF: predicated region fallthrough
CT: control target
= control target key end

     0   :  { %s1816_s27 = smov 0   ;;  %s2112_s0 = inlined_call_operand.vmem [shape: f32[256,16], index: 0, kind: input, shape index: {}]   ;;  %s2113_s1 = inlined_call_operand.vmem [shape: bf16[16,256], index: 1, kind: input, shape index: {}]   ;;  %s2114_s2 = inlined_call_operand.vmem [shape: f32[1,256], index: 2, kind: input, shape index: {}]   ;;  %s2115_s3 = inlined_call_operand.vmem [shape: bf16[128,128], index: 3, kind: input, shape index: {}]   ;;  %s2116_s4 = inlined_call_operand.vmem [shape: bf16[128,128], index: 4, kind: input, shape index: {}]   ;;  %s2117_s5 = inlined_call_operand.vmem [shape: f32[1,128], index: 5, kind: input, shape index: {}]   ;;  %s2118_s6 = inlined_call_operand.vmem [shape: bf16[128,128], index: 6, kind: input, shape index: {}]   ;;  %s2119_s7 = inlined_call_operand.vmem [shape: f32[1,128], index: 7, kind: input, shape index: {}]   ;;  %s2120_s8 = inlined_call_operand.vmem [shape: bf16[256,256], index: 8, kind: output, shape index: {}]  }
   0x1 LB: > { %s1373_s28 = sadd.s32 4294967295, %s1768_s27   ;;  %p1377_p0 = scmp.ge.s32.totalorder %s1768_s27, 1  ;;  %s1768_s27 = sphi %s1816_s27, %s18_s27  }
   0x2   : > { %p263_p1 = scmp.lt.s32.totalorder %s1768_s27, 3 }
   0x4   : > { %p264_p2 = pnand %p1377_p0, %p263_p1 }
   0x5   : > { %s1378_s9 = sshll.u32 (!%p264_p2), %s1373_s28, 4 }
   0x6   : > { %267 = sbr.rel (%p264_p2) target bundleno = 940 (0x3ac), region = 52  ;;  %p299_p3 = scmp.lt.s32.totalorder (!%p264_p2), %s1378_s9, 31 }
   0xb   : > { %v1639_v0 = vld [vmem:[%s2113_s1 + $0x4] ss:$8 sps:$4 sm:$0xff]   ;;  %v1641_v1 = vld [vmem:[%s2113_s1] ss:$8 sps:$4 sm:$0xff]   ;;  %v1770_v2 = vmov 0   ;;  %v1642_v3 = vld [vmem:[%s2116_s4 + $0x38] sm:$0xff]   ;;  %v340_v35 = vlaneseq }
   0xc   : > { %417 = vmatprep.mubr.bf16.mxu0 %v1770_v2  ;;  %399 = vmatprep.subr.bf16.mxu0 %v1639_v0  ;;  %s2122_s9 = smov (!%p299_p3, %s1378_s9), 31  ;;  %v1643_v4 = vld [vmem:[%s2116_s4 + $0x30] sm:$0xff]   ;;  %v1644_v5 = vld [vmem:[%s2116_s4 + $0x28] sm:$0xff]   ;;  %vm360_vm0 = vcmask 130048   ;;  %v1645_v9 = vld [vmem:[%s2116_s4 + $0x20] sm:$0xff]  }
   0xd   : > { %400 = vmatpush1.bf16.msra.mxu0 %v1641_v1  ;;  %1534 = vmatprep.subr.bf16.mxu1 %v1642_v3  ;;  %s1379_s16 = sshll.u32 %s2122_s9, 3  ;;  %v1646_v31 = vld [vmem:[%s2116_s4 + $0x18] sm:$0xff]   ;;  %v1647_v32 = vld [vmem:[%s2116_s4 + $0x10] sm:$0xff]   ;;  %v1648_v33 = vld [vmem:[%s2116_s4 + $0x8] sm:$0xff]   ;;  %v1888_v36 = vshrl.u32 %v340_v35, 7 }
   0xe   : > { %1535 = vmatpush3.bf16.msra.mxu1 %v1642_v3  ;;  %s1847_s21 = scalar_lea.vmem %s2112_s0, %s1379_s16  ;;  %v1649_v34 = vld [vmem:[%s2116_s4] sm:$0xff]   ;;  %s2004_s26 = scalar_lea.vmem %s2120_s8, %s1379_s16 }
   0xf   : > { %1536 = vmatprep.subr.bf16.mxu1 %v1643_v4  ;;  %v312_v6 = vld [vmem:[%s1847_s21] sm:$0xff]  ;;  %v313_v7 = vld [vmem:[%s1847_s21 + $0x8] sm:$0xff]  ;;  %v314_v10 = vld [vmem:[%s1847_s21 + $0x10] sm:$0xff]  ;;  %v342_v37 = vsub.s32 0, %v1888_v36 }
  0x10   : > { %v328_v8 = vpack.c.bf16 %v313_v7, %v312_v6  ;;  %v315_v11 = vld [vmem:[%s1847_s21 + $0x18] sm:$0xff]  ;;  %v316_v13 = vld [vmem:[%s1847_s21 + $0x20] sm:$0xff]  ;;  %v317_v14 = vld [vmem:[%s1847_s21 + $0x28] sm:$0xff] }
  0x11   : > { %v329_v12 = vpack.c.bf16 %v315_v11, %v314_v10  ;;  %v330_v15 = vpack.c.bf16 %v317_v14, %v316_v13  ;;  %v318_v16 = vld [vmem:[%s1847_s21 + $0x30] sm:$0xff]  ;;  %v319_v17 = vld [vmem:[%s1847_s21 + $0x38] sm:$0xff]  ;;  %v320_v19 = vld [vmem:[%s1847_s21 + $0x40] sm:$0xff] }
  0x12   : > { %1537 = vmatpush3.bf16.msra.mxu1 %v1643_v4  ;;  %1385 = vmatmul.mubr.msk.bf16.vlgmr.msra.gmra.mxu0 %vm360_vm0, %v328_v8  ;;  %v331_v18 = vpack.c.bf16 %v319_v17, %v318_v16  ;;  %v321_v20 = vld [vmem:[%s1847_s21 + $0x48] sm:$0xff]  ;;  %v322_v22 = vld [vmem:[%s1847_s21 + $0x50] sm:$0xff]  ;;  %v323_v23 = vld [vmem:[%s1847_s21 + $0x58] sm:$0xff] }
  0x13   : > { %1538 = vmatprep.subr.bf16.mxu1 %v1644_v5  ;;  %427 = vmatprep.mubr.bf16.mxu0 %v1770_v2  ;;  %v332_v21 = vpack.c.bf16 %v321_v20, %v320_v19  ;;  %v333_v24 = vpack.c.bf16 %v323_v23, %v322_v22  ;;  %v324_v25 = vld [vmem:[%s1847_s21 + $0x60] sm:$0xff]  ;;  %v325_v26 = vld [vmem:[%s1847_s21 + $0x68] sm:$0xff]  ;;  %v326_v28 = vld [vmem:[%s1847_s21 + $0x70] sm:$0xff] }
  0x14   : > { %v334_v27 = vpack.c.bf16 %v325_v26, %v324_v25  ;;  %v327_v29 = vld [vmem:[%s1847_s21 + $0x78] sm:$0xff]  ;;  %v1894_v38 = vld [vmem:[%s2114_s2] sm:$0x3] }
  0x15   : > { %v335_v30 = vpack.c.bf16 %v327_v29, %v326_v28  ;;  %v1897_v39 = vrot.slane %v1894_v38, %v342_v37 }
  0x16   : > { %1539 = vmatpush3.bf16.msra.mxu1 %v1644_v5 }
  0x17   : > { %1540 = vmatprep.subr.bf16.mxu1 %v1645_v9 }
  0x1a   : > { %1541 = vmatpush3.bf16.msra.mxu1 %v1645_v9  ;;  %1386 = vmatmul.mubr.msk.bf16.gmra.mxu0 %vm360_vm0, %v329_v12 }
  0x1b   : > { %437 = vmatprep.mubr.bf16.mxu0 %v1770_v2  ;;  %1542 = vmatprep.subr.bf16.mxu1 %v1646_v31 }
  0x1e   : > { %1543 = vmatpush3.bf16.msra.mxu1 %v1646_v31 }
  0x1f   : > { %1544 = vmatprep.subr.bf16.mxu1 %v1647_v32 }
  0x22   : > { %1387 = vmatmul.mubr.msk.bf16.gmra.mxu0 %vm360_vm0, %v330_v15  ;;  %1545 = vmatpush3.bf16.msra.mxu1 %v1647_v32 }
  0x23   : > { %447 = vmatprep.mubr.bf16.mxu0 %v1770_v2  ;;  %1546 = vmatprep.subr.bf16.mxu1 %v1648_v33 }
  0x26   : > { %1547 = vmatpush3.bf16.msra.mxu1 %v1648_v33 }
  0x27   : > { %1548 = vmatprep.subr.bf16.mxu1 %v1649_v34 }
  0x2a   : > { %1388 = vmatmul.mubr.msk.bf16.gmra.mxu0 %vm360_vm0, %v331_v18  ;;  %1549 = vmatpush3.bf16.msra.mxu1 %v1649_v34 }
  0x2b   : > { %457 = vmatprep.mubr.bf16.mxu0 %v1770_v2 }
  0x32   : > { %1389 = vmatmul.mubr.msk.bf16.gmra.mxu0 %vm360_vm0, %v332_v21 }
  0x33   : > { %467 = vmatprep.mubr.bf16.mxu0 %v1770_v2 }
  0x3a   : > { %1390 = vmatmul.mubr.msk.bf16.gmra.mxu0 %vm360_vm0, %v333_v24 }
  0x3b   : > { %477 = vmatprep.mubr.bf16.mxu0 %v1770_v2 }
  0x42   : > { %1391 = vmatmul.mubr.msk.bf16.gmra.mxu0 %vm360_vm0, %v334_v27 }
  0x43   : > { %487 = vmatprep.mubr.bf16.mxu0 %v1770_v2 }
  0x4a   : > { %1392 = vmatmul.mubr.msk.bf16.gmra.mxu0 %vm360_vm0, %v335_v30 }
  0xd2   : > { %v419_v40 = vpop.f32.mrf.mxu0 }
  0xd3   : > { %v420_v42 = vadd.f32 %v419_v40, %v1897_v39 }
  0xd4   : > { %v1899_v41 = vpop.f32.mrf.mxu0 }
  0xd5   : > { %v498_v46 = vmax.f32 %v420_v42, 0.0 }
  0xd6   : > { %v423_v43 = vpop.f32.mrf.mxu0 }
  0xd7   : > { %v424_v44 = vadd.f32 %v423_v43, %v1897_v39 }
  0xd8   : > { %v1903_v45 = vpop.f32.mrf.mxu0 }
  0xd9   : > { %v499_v47 = vmax.f32 %v424_v44, 0.0 }
  0xda   : > { %v429_v48 = vpop.f32.mrf.mxu0 }
  0xdb   : > { %v514_v49 = vpack.c.bf16 %v499_v47, %v498_v46  ;;  %v430_v51 = vadd.f32 %v429_v48, %v1897_v39 }
  0xdc   : > { %v1905_v50 = vpop.f32.mrf.mxu0 }
  0xdd   : > { %1550 = vmatprep.mubr.bf16.mxu1 %v514_v49  ;;  %v500_v55 = vmax.f32 %v430_v51, 0.0 }
  0xde   : > { %v433_v52 = vpop.f32.mrf.mxu0 }
  0xdf   : > { %v434_v53 = vadd.f32 %v433_v52, %v1897_v39 }
  0xe0   : > { %v1909_v54 = vpop.f32.mrf.mxu0 }
  0xe1   : > { %v501_v56 = vmax.f32 %v434_v53, 0.0  ;;  %v1650_v53 = vld [vmem:[%s2115_s3 + $0x38] sm:$0xff]  }
  0xe2   : > { %v439_v57 = vpop.f32.mrf.mxu0  ;;  %1566 = vmatprep.subr.bf16.mxu1 %v1650_v53 }
  0xe3   : > { %v515_v58 = vpack.c.bf16 %v501_v56, %v500_v55  ;;  %v440_v60 = vadd.f32 %v439_v57, %v1897_v39  ;;  %v1651_v55 = vld [vmem:[%s2115_s3 + $0x30] sm:$0xff]   ;;  %v1653_v56 = vld [vmem:[%s2115_s3 + $0x20] sm:$0xff]   ;;  %v1654_v57 = vld [vmem:[%s2115_s3 + $0x18] sm:$0xff]  }
  0xe4   : > { %v1911_v59 = vpop.f32.mrf.mxu0 }
  0xe5   : > { %1551 = vmatmul.mubr.bf16.vlgmr.msra.gmra.mxu1 %v515_v58  ;;  %v502_v0 = vmax.f32 %v440_v60, 0.0  ;;  %v1655_v58 = vld [vmem:[%s2115_s3 + $0x10] sm:$0xff]   ;;  %v1656_v60 = vld [vmem:[%s2115_s3 + $0x8] sm:$0xff]  }
  0xe6   : > { %v443_v61 = vpop.f32.mrf.mxu0  ;;  %1567 = vmatpush3.bf16.msra.mxu1 %v1650_v53 }
  0xe7   : > { %v444_v62 = vadd.f32 %v443_v61, %v1897_v39  ;;  %1568 = vmatprep.subr.bf16.mxu1 %v1651_v55  ;;  %v1657_v61 = vld [vmem:[%s2115_s3] sm:$0xff]  }
  0xe8   : > { %v1915_v63 = vpop.f32.mrf.mxu0 }
  0xe9   : > { %v503_v1 = vmax.f32 %v444_v62, 0.0  ;;  %v1658_v62 = vld [vmem:[%s2118_s6 + $0x38] sm:$0xff]  }
  0xea   : > { %v449_v2 = vpop.f32.mrf.mxu0  ;;  %1569 = vmatpush3.bf16.msra.mxu1 %v1651_v55  ;;  %1598 = vmatprep.subr.bf16.mxu0 %v1658_v62 }
  0xeb   : > { %v516_v3 = vpack.c.bf16 %v503_v1, %v502_v0  ;;  %v450_v5 = vadd.f32 %v449_v2, %v1897_v39  ;;  %v1659_v0 = vld [vmem:[%s2118_s6 + $0x30] sm:$0xff]   ;;  %1599 = vmatpush3.bf16.msra.mxu0 %v1658_v62  ;;  %v1660_v1 = vld [vmem:[%s2118_s6 + $0x28] sm:$0xff]   ;;  %v1661_v2 = vld [vmem:[%s2118_s6 + $0x20] sm:$0xff]  }
  0xec   : > { %v1917_v4 = vpop.f32.mrf.mxu0  ;;  %1600 = vmatprep.subr.bf16.mxu0 %v1659_v0 }
  0xed   : > { %1554 = vmatprep.mubr.bf16.mxu1 %v516_v3  ;;  %v504_v9 = vmax.f32 %v450_v5, 0.0  ;;  %v1662_v3 = vld [vmem:[%s2118_s6 + $0x18] sm:$0xff]   ;;  %v1987_v5 = vld [vmem:[%s2117_s5] ss:$0 sm:$0xff] }
  0xee   : > { %v453_v6 = vpop.f32.mrf.mxu0 }
  0xef   : > { %v454_v7 = vadd.f32 %v453_v6, %v1897_v39  ;;  %1601 = vmatpush3.bf16.msra.mxu0 %v1659_v0 }
  0xf0   : > { %v1921_v8 = vpop.f32.mrf.mxu0  ;;  %1602 = vmatprep.subr.bf16.mxu0 %v1660_v1 }
  0xf1   : > { %v505_v10 = vmax.f32 %v454_v7, 0.0 }
  0xf2   : > { %v459_v11 = vpop.f32.mrf.mxu0 }
  0xf3   : > { %v517_v12 = vpack.c.bf16 %v505_v10, %v504_v9  ;;  %v460_v14 = vadd.f32 %v459_v11, %v1897_v39  ;;  %1603 = vmatpush3.bf16.msra.mxu0 %v1660_v1 }
  0xf4   : > { %v1923_v13 = vpop.f32.mrf.mxu0  ;;  %1604 = vmatprep.subr.bf16.mxu0 %v1661_v2 }
  0xf5   : > { %1555 = vmatmul.mubr.bf16.gmra.mxu1 %v517_v12  ;;  %v506_v18 = vmax.f32 %v460_v14, 0.0 }
  0xf6   : > { %v463_v15 = vpop.f32.mrf.mxu0 }
  0xf7   : > { %v464_v16 = vadd.f32 %v463_v15, %v1897_v39  ;;  %1605 = vmatpush3.bf16.msra.mxu0 %v1661_v2 }
  0xf8   : > { %v1927_v17 = vpop.f32.mrf.mxu0  ;;  %1606 = vmatprep.subr.bf16.mxu0 %v1662_v3 }
  0xf9   : > { %v507_v19 = vmax.f32 %v464_v16, 0.0 }
  0xfa   : > { %v469_v20 = vpop.f32.mrf.mxu0 }
  0xfb   : > { %v518_v21 = vpack.c.bf16 %v507_v19, %v506_v18  ;;  %v470_v23 = vadd.f32 %v469_v20, %v1897_v39  ;;  %1607 = vmatpush3.bf16.msra.mxu0 %v1662_v3 }
  0xfc   : > { %v1929_v22 = vpop.f32.mrf.mxu0 }
  0xfd   : > { %1558 = vmatprep.mubr.bf16.mxu1 %v518_v21  ;;  %v508_v27 = vmax.f32 %v470_v23, 0.0 }
  0xfe   : > { %v473_v24 = vpop.f32.mrf.mxu0 }
  0xff   : > { %v474_v25 = vadd.f32 %v473_v24, %v1897_v39 }
 0x100   : > { %v1933_v26 = vpop.f32.mrf.mxu0 }
 0x101   : > { %v509_v28 = vmax.f32 %v474_v25, 0.0 }
 0x102   : > { %v479_v29 = vpop.f32.mrf.mxu0 }
 0x103   : > { %v519_v30 = vpack.c.bf16 %v509_v28, %v508_v27  ;;  %v480_v32 = vadd.f32 %v479_v29, %v1897_v39 }
 0x104   : > { %v1935_v31 = vpop.f32.mrf.mxu0 }
 0x105   : > { %1559 = vmatmul.mubr.bf16.gmra.mxu1 %v519_v30  ;;  %v510_v37 = vmax.f32 %v480_v32, 0.0 }
 0x106   : > { %v483_v33 = vpop.f32.mrf.mxu0 }
 0x107   : > { %v484_v34 = vadd.f32 %v483_v33, %v1897_v39 }
 0x108   : > { %v1939_v35 = vpop.f32.mrf.mxu0 }
 0x109   : > { %v511_v40 = vmax.f32 %v484_v34, 0.0 }
 0x10a   : > { %v489_v42 = vpop.f32.mrf.mxu0 }
 0x10b   : > { %v520_v43 = vpack.c.bf16 %v511_v40, %v510_v37  ;;  %v490_v46 = vadd.f32 %v489_v42, %v1897_v39 }
 0x10c   : > { %v1941_v44 = vpop.f32.mrf.mxu0 }
 0x10d   : > { %1562 = vmatprep.mubr.bf16.mxu1 %v520_v43  ;;  %v512_v49 = vmax.f32 %v490_v46, 0.0 }
 0x10e   : > { %v493_v47 = vpop.f32.mrf.mxu0 }
 0x10f   : > { %v494_v48 = vadd.f32 %v493_v47, %v1897_v39  ;;  %v1652_v39 = vld [vmem:[%s2115_s3 + $0x28] sm:$0xff]  }
 0x110   : > { %1570 = vmatprep.subr.bf16.mxu1 %v1652_v39 }
 0x111   : > { %v513_v51 = vmax.f32 %v494_v48, 0.0  ;;  %1571 = vmatpush3.bf16.msra.mxu1 %v1652_v39 }
 0x112   : > { %1572 = vmatprep.subr.bf16.mxu1 %v1653_v56 }
 0x113   : > { %v521_v52 = vpack.c.bf16 %v513_v51, %v512_v49 }
 0x115   : > { %1563 = vmatmul.mubr.bf16.gmra.mxu1 %v521_v52 }
 0x116   : > { %1573 = vmatpush3.bf16.msra.mxu1 %v1653_v56 }
 0x117   : > { %1574 = vmatprep.subr.bf16.mxu1 %v1654_v57 }
 0x11a   : > { %1575 = vmatpush3.bf16.msra.mxu1 %v1654_v57 }
 0x11b   : > { %1576 = vmatprep.subr.bf16.mxu1 %v1655_v58 }
 0x11e   : > { %1577 = vmatpush3.bf16.msra.mxu1 %v1655_v58 }
 0x11f   : > { %1578 = vmatprep.subr.bf16.mxu1 %v1656_v60 }
 0x122   : > { %1579 = vmatpush3.bf16.msra.mxu1 %v1656_v60 }
 0x123   : > { %1580 = vmatprep.subr.bf16.mxu1 %v1657_v61 }
 0x126   : > { %1581 = vmatpush3.bf16.msra.mxu1 %v1657_v61 }
 0x1a5   : > { %v1552_v6 = vpop.f32.mrf.mxu1 }
 0x1a6   : > { %v636_v7 = vadd.f32 %v1552_v6, %v1987_v5 }
 0x1a7   : > { %v627_v9 = vpop.f32.mrf.mxu1 }
 0x1a8   : > { %v692_v10 = vsub.f32 0.0, %v636_v7  ;;  %v628_v11 = vadd.f32 %v1987_v5, %v627_v9 }
 0x1a9   : > { %v1553_v12 = vpop.f32.mrf.mxu1 }
 0x1aa   : > { %v710_v14 = vmul.f32 1.442695, %v692_v10  ;;  %v690_v15 = vsub.f32 0.0, %v628_v11  ;;  %v639_v16 = vadd.f32 %v1553_v12, %v1987_v5 }
 0x1ab   : > { %v630_v18 = vpop.f32.mrf.mxu1 }
 0x1ac   : > { %1666 = vpow2.f32 %v710_v14  ;;  %v706_v19 = vmul.f32 1.442695, %v690_v15  ;;  %v693_v20 = vsub.f32 0.0, %v639_v16  ;;  %v631_v21 = vadd.f32 %v1987_v5, %v630_v18 }
 0x1ae   : > { %1668 = vpow2.f32 %v706_v19  ;;  %v712_v23 = vmul.f32 1.442695, %v693_v20  ;;  %v691_v24 = vsub.f32 0.0, %v631_v21 }
 0x1b0   : > { %1670 = vpow2.f32 %v712_v23  ;;  %v708_v25 = vmul.f32 1.442695, %v691_v24 }
 0x1b2   : > { %1672 = vpow2.f32 %v708_v25 }
 0x1b5   : > { %v1556_v27 = vpop.f32.mrf.mxu1 }
 0x1b6   : > { %v652_v28 = vadd.f32 %v1556_v27, %v1987_v5 }
 0x1b7   : > { %v643_v29 = vpop.f32.mrf.mxu1 }
 0x1b8   : > { %v696_v30 = vsub.f32 0.0, %v652_v28  ;;  %v644_v32 = vadd.f32 %v1987_v5, %v643_v29 }
 0x1b9   : > { %v1667_v33 = vpop.eup %1666  ;;  %v1557_v34 = vpop.f32.mrf.mxu1 }
 0x1ba   : > { %v740_v37 = vadd.f32 1.0, %v1667_v33  ;;  %v718_v40 = vmul.f32 1.442695, %v696_v30  ;;  %v694_v42 = vsub.f32 0.0, %v644_v32  ;;  %v655_v43 = vadd.f32 %v1557_v34, %v1987_v5 }
 0x1bb   : > { %v1669_v46 = vpop.eup %1668  ;;  %v646_v47 = vpop.f32.mrf.mxu1 }
 0x1bc   : > { %1674 = vrcp.f32 %v740_v37  ;;  %v738_v48 = vadd.f32 1.0, %v1669_v46  ;;  %v714_v49 = vmul.f32 1.442695, %v694_v42  ;;  %v697_v51 = vsub.f32 0.0, %v655_v43 }
 0x1bd   : > { %v1671_v52 = vpop.eup %1670  ;;  %1676 = vpow2.f32 %v718_v40  ;;  %v647_v53 = vadd.f32 %v1987_v5, %v646_v47 }
 0x1be   : > { %1678 = vrcp.f32 %v738_v48  ;;  %v741_v55 = vadd.f32 1.0, %v1671_v52  ;;  %v720_v39 = vmul.f32 1.442695, %v697_v51 }
 0x1bf   : > { %v1673_v56 = vpop.eup %1672  ;;  %1680 = vpow2.f32 %v714_v49  ;;  %v695_v57 = vsub.f32 0.0, %v647_v53 }
 0x1c0   : > { %1682 = vrcp.f32 %v741_v55  ;;  %v739_v58 = vadd.f32 1.0, %v1673_v56 }
 0x1c1   : > { %1684 = vpow2.f32 %v720_v39  ;;  %v716_v60 = vmul.f32 1.442695, %v695_v57 }
 0x1c2   : > { %1686 = vrcp.f32 %v739_v58 }
 0x1c3   : > { %1688 = vpow2.f32 %v716_v60 }
 0x1c5   : > { %v1560_v61 = vpop.f32.mrf.mxu1 }
 0x1c6   : > { %v668_v62 = vadd.f32 %v1560_v61, %v1987_v5 }
 0x1c7   : > { %v659_v0 = vpop.f32.mrf.mxu1 }
 0x1c8   : > { %v700_v1 = vsub.f32 0.0, %v668_v62  ;;  %v660_v2 = vadd.f32 %v1987_v5, %v659_v0 }
 0x1c9   : > { %v1675_v3 = vpop.eup %1674  ;;  %v1561_v6 = vpop.f32.mrf.mxu1 }
 0x1ca   : > { %v1677_v7 = vpop.eup %1676  ;;  %v1456_v9 = vpack.c.bf16 %v1675_v3, %v1675_v3  ;;  %v726_v10 = vmul.f32 1.442695, %v700_v1  ;;  %v698_v11 = vsub.f32 0.0, %v660_v2  ;;  %v671_v12 = vadd.f32 %v1561_v6, %v1987_v5 }
 0x1cb   : > { %v1679_v14 = vpop.eup %1678  ;;  %v744_v15 = vadd.f32 1.0, %v1677_v7  ;;  %v662_v16 = vpop.f32.mrf.mxu1 }
 0x1cc   : > { %v1681_v18 = vpop.eup %1680  ;;  %1221 = vst [vmem:[%s2004_s26 + $0x10] sm:$0xf] %v1456_v9  ;;  %v1454_v19 = vpack.c.bf16 %v1679_v14, %v1679_v14  ;;  %1690 = vpow2.f32 %v726_v10  ;;  %v722_v20 = vmul.f32 1.442695, %v698_v11  ;;  %v701_v21 = vsub.f32 0.0, %v671_v12 }
 0x1cd   : > { %v1683_v23 = vpop.eup %1682  ;;  %1692 = vrcp.f32 %v744_v15  ;;  %v742_v24 = vadd.f32 1.0, %v1681_v18  ;;  %v663_v25 = vadd.f32 %v1987_v5, %v662_v16 }
 0x1ce   : > { %v1685_v27 = vpop.eup %1684  ;;  %1219 = vst [vmem:[%s2004_s26] sm:$0xf] %v1454_v19  ;;  %v1457_v28 = vpack.c.bf16 %v1683_v23, %v1683_v23  ;;  %1694 = vpow2.f32 %v722_v20  ;;  %v728_v29 = vmul.f32 1.442695, %v701_v21  ;;  %v771_v46 = vpack.c.bf16 %v1683_v23, %v1675_v3 }
 0x1cf   : > { %v1687_v30 = vpop.eup %1686  ;;  %1696 = vrcp.f32 %v742_v24  ;;  %v745_v32 = vadd.f32 1.0, %v1685_v27  ;;  %v699_v33 = vsub.f32 0.0, %v663_v25 }
 0x1d0   : > { %v1689_v34 = vpop.eup %1688  ;;  %1222 = vst [vmem:[%s2004_s26 + $0x18] sm:$0xf] %v1457_v28  ;;  %v1455_v37 = vpack.c.bf16 %v1687_v30, %v1687_v30  ;;  %1698 = vpow2.f32 %v728_v29  ;;  %v770_v40 = vpack.c.bf16 %v1687_v30, %v1679_v14 }
 0x1d1   : > { %1700 = vrcp.f32 %v745_v32  ;;  %v743_v42 = vadd.f32 1.0, %v1689_v34  ;;  %v724_v43 = vmul.f32 1.442695, %v699_v33 }
 0x1d2   : > { %1220 = vst [vmem:[%s2004_s26 + $0x8] sm:$0xf] %v1455_v37  ;;  %1582 = vmatprep.mubr.bf16.mxu1 %v770_v40 }
 0x1d3   : > { %1702 = vrcp.f32 %v743_v42  ;;  %1583 = vmatmul.mubr.bf16.vlgmr.msra.gmra.mxu1 %v771_v46 }
 0x1d4   : > { %1704 = vpow2.f32 %v724_v43 }
 0x1d5   : > { %v1564_v47 = vpop.f32.mrf.mxu1 }
 0x1d6   : > { %v684_v48 = vadd.f32 %v1564_v47, %v1987_v5 }
 0x1d7   : > { %v675_v49 = vpop.f32.mrf.mxu1 }
 0x1d8   : > { %v704_v51 = vsub.f32 0.0, %v684_v48  ;;  %v676_v52 = vadd.f32 %v1987_v5, %v675_v49 }
 0x1d9   : > { %v1691_v53 = vpop.eup %1690  ;;  %v1565_v55 = vpop.f32.mrf.mxu1 }
 0x1da   : > { %v1693_v39 = vpop.eup %1692  ;;  %v748_v56 = vadd.f32 1.0, %v1691_v53  ;;  %v734_v57 = vmul.f32 1.442695, %v704_v51  ;;  %v702_v58 = vsub.f32 0.0, %v676_v52  ;;  %v687_v60 = vadd.f32 %v1565_v55, %v1987_v5 }
 0x1db   : > { %v1695_v61 = vpop.eup %1694  ;;  %v1460_v62 = vpack.c.bf16 %v1693_v39, %v1693_v39  ;;  %v678_v0 = vpop.f32.mrf.mxu1 }
 0x1dc   : > { %v1697_v1 = vpop.eup %1696  ;;  %1706 = vrcp.f32 %v748_v56  ;;  %v746_v2 = vadd.f32 1.0, %v1695_v61  ;;  %v730_v3 = vmul.f32 1.442695, %v702_v58  ;;  %v705_v6 = vsub.f32 0.0, %v687_v60 }
 0x1dd   : > { %v1699_v7 = vpop.eup %1698  ;;  %1225 = vst [vmem:[%s2004_s26 + $0x30] sm:$0xf] %v1460_v62  ;;  %v1458_v9 = vpack.c.bf16 %v1697_v1, %v1697_v1  ;;  %1708 = vpow2.f32 %v734_v57  ;;  %v679_v10 = vadd.f32 %v1987_v5, %v678_v0 }
 0x1de   : > { %v1701_v11 = vpop.eup %1700  ;;  %1710 = vrcp.f32 %v746_v2  ;;  %v749_v12 = vadd.f32 1.0, %v1699_v7  ;;  %v736_v14 = vmul.f32 1.442695, %v705_v6  ;;  %v1664_v2 = vld [vmem:[%s2118_s6 + $0x8] sm:$0xff]   ;;  %v346_v6 = vsub.s32 1, %v1888_v36 }
 0x1df   : > { %1223 = vst [vmem:[%s2004_s26 + $0x20] sm:$0xf] %v1458_v9  ;;  %v1461_v15 = vpack.c.bf16 %v1701_v11, %v1701_v11  ;;  %1712 = vpow2.f32 %v730_v3  ;;  %v703_v16 = vsub.f32 0.0, %v679_v10  ;;  %v773_v5 = vpack.c.bf16 %v1701_v11, %v1693_v39  ;;  %v1665_v3 = vld [vmem:[%s2118_s6] sm:$0xff]  }
 0x1e0   : > { %v1703_v18 = vpop.eup %1702  ;;  %1714 = vrcp.f32 %v749_v12  ;;  %v2039_v7 = vrot.slane %v1894_v38, %v346_v6 }
 0x1e1   : > { %v1705_v19 = vpop.eup %1704  ;;  %1226 = vst [vmem:[%s2004_s26 + $0x38] sm:$0xf] %v1461_v15  ;;  %v1459_v20 = vpack.c.bf16 %v1703_v18, %v1703_v18  ;;  %1716 = vpow2.f32 %v736_v14  ;;  %v732_v21 = vmul.f32 1.442695, %v703_v16  ;;  %v772_v23 = vpack.c.bf16 %v1703_v18, %v1697_v1  ;;  %v1663_v1 = vld [vmem:[%s2118_s6 + $0x10] sm:$0xff]  }
 0x1e2   : > { %v747_v24 = vadd.f32 1.0, %v1705_v19  ;;  %1608 = vmatprep.subr.bf16.mxu0 %v1663_v1  ;;  %v432_v10 = vadd.f32 %v1905_v50, %v2039_v7  ;;  %v422_v12 = vadd.f32 %v1899_v41, %v2039_v7  ;;  %v436_v14 = vadd.f32 %v1909_v54, %v2039_v7 }
 0x1e3   : > { %1224 = vst [vmem:[%s2004_s26 + $0x28] sm:$0xf] %v1459_v20  ;;  %1718 = vpow2.f32 %v732_v21  ;;  %1586 = vmatprep.mubr.bf16.mxu1 %v772_v23  ;;  %1609 = vmatpush3.bf16.msra.mxu0 %v1663_v1  ;;  %v426_v18 = vadd.f32 %v1903_v45, %v2039_v7  ;;  %v452_v54 = vadd.f32 %v1917_v4, %v2039_v7 }
 0x1e4   : > { %1720 = vrcp.f32 %v747_v24  ;;  %1587 = vmatmul.mubr.bf16.gmra.mxu1 %v773_v5  ;;  %1610 = vmatprep.subr.bf16.mxu0 %v1664_v2  ;;  %v442_v45 = vadd.f32 %v1911_v59, %v2039_v7  ;;  %v492_v6 = vadd.f32 %v1941_v44, %v2039_v7  ;;  %v2075_v44 = vld [vmem:[%s2119_s7] ss:$0 sm:$0xff] }
 0x1e7   : > { %1611 = vmatpush3.bf16.msra.mxu0 %v1664_v2 }
 0x1e8   : > { %1612 = vmatprep.subr.bf16.mxu0 %v1665_v3 }
 0x1e9   : > { %v1707_v25 = vpop.eup %1706 }
 0x1ea   : > { %v1709_v27 = vpop.eup %1708  ;;  %v1464_v28 = vpack.c.bf16 %v1707_v25, %v1707_v25 }
 0x1eb   : > { %v1711_v29 = vpop.eup %1710  ;;  %v752_v30 = vadd.f32 1.0, %v1709_v27  ;;  %1613 = vmatpush3.bf16.msra.mxu0 %v1665_v3  ;;  %v482_v3 = vadd.f32 %v1935_v31, %v2039_v7 }
 0x1ec   : > { %v1713_v32 = vpop.eup %1712  ;;  %1229 = vst [vmem:[%s2004_s26 + $0x50] sm:$0xf] %v1464_v28  ;;  %v1462_v33 = vpack.c.bf16 %v1711_v29, %v1711_v29  ;;  %v456_v28 = vadd.f32 %v1921_v8, %v2039_v7  ;;  %v472_v8 = vadd.f32 %v1929_v22, %v2039_v7 }
 0x1ed   : > { %v1715_v34 = vpop.eup %1714  ;;  %1722 = vrcp.f32 %v752_v30  ;;  %v750_v37 = vadd.f32 1.0, %v1713_v32  ;;  %v446_v32 = vadd.f32 %v1915_v63, %v2039_v7  ;;  %v462_v63 = vadd.f32 %v1923_v13, %v2039_v7  ;;  %v495_v13 = vpop.f32.mrf.mxu0 }
 0x1ee   : > { %v1717_v40 = vpop.eup %1716  ;;  %1227 = vst [vmem:[%s2004_s26 + $0x40] sm:$0xf] %v1462_v33  ;;  %v1465_v42 = vpack.c.bf16 %v1715_v34, %v1715_v34  ;;  %v775_v52 = vpack.c.bf16 %v1715_v34, %v1707_v25 }
 0x1ef   : > { %1724 = vrcp.f32 %v750_v37  ;;  %v753_v43 = vadd.f32 1.0, %v1717_v40 }
 0x1f0   : > { %v1719_v46 = vpop.eup %1718  ;;  %1230 = vst [vmem:[%s2004_s26 + $0x58] sm:$0xf] %v1465_v42 }
 0x1f1   : > { %v1721_v47 = vpop.eup %1720  ;;  %1726 = vrcp.f32 %v753_v43  ;;  %v751_v48 = vadd.f32 1.0, %v1719_v46 }
 0x1f2   : > { %v1463_v49 = vpack.c.bf16 %v1721_v47, %v1721_v47  ;;  %v774_v51 = vpack.c.bf16 %v1721_v47, %v1711_v29 }
 0x1f3   : > { %1728 = vrcp.f32 %v751_v48 }
 0x1f4   : > { %1228 = vst [vmem:[%s2004_s26 + $0x48] sm:$0xf] %v1463_v49  ;;  %1590 = vmatprep.mubr.bf16.mxu1 %v774_v51  ;;  %v476_v51 = vadd.f32 %v1933_v26, %v2039_v7 }
 0x1f5   : > { %1591 = vmatmul.mubr.bf16.gmra.mxu1 %v775_v52 }
 0x1fa   : > { %v1723_v53 = vpop.eup %1722 }
 0x1fb   : > { %v1468_v55 = vpack.c.bf16 %v1723_v53, %v1723_v53 }
 0x1fc   : > { %v1725_v39 = vpop.eup %1724 }
 0x1fd   : > { %1233 = vst [vmem:[%s2004_s26 + $0x70] sm:$0xf] %v1468_v55  ;;  %v1466_v56 = vpack.c.bf16 %v1725_v39, %v1725_v39  ;;  %v466_v55 = vadd.f32 %v1927_v17, %v2039_v7  ;;  %v496_v17 = vadd.f32 %v495_v13, %v2039_v7 }
 0x1fe   : > { %v1727_v57 = vpop.eup %1726 }
 0x1ff   : > { %1231 = vst [vmem:[%s2004_s26 + $0x60] sm:$0xf] %v1466_v56  ;;  %v1469_v58 = vpack.c.bf16 %v1727_v57, %v1727_v57  ;;  %v777_v0 = vpack.c.bf16 %v1727_v57, %v1723_v53 }
 0x200   : > { %v1729_v60 = vpop.eup %1728 }
 0x201   : > { %1234 = vst [vmem:[%s2004_s26 + $0x78] sm:$0xf] %v1469_v58  ;;  %v1467_v61 = vpack.c.bf16 %v1729_v60, %v1729_v60  ;;  %v776_v62 = vpack.c.bf16 %v1729_v60, %v1725_v39 }
 0x203   : > { %1232 = vst [vmem:[%s2004_s26 + $0x68] sm:$0xf] %v1467_v61  ;;  %1594 = vmatprep.mubr.bf16.mxu1 %v776_v62 }
 0x204   : > { %1595 = vmatmul.mubr.bf16.gmra.mxu1 %v777_v0 }
 0x293   : > { %v1584_v9 = vpop.f32.mrf.mxu1 }
 0x294   : > { %v941_v15 = vadd.f32 %v1584_v9, %v432_v10  ;;  %v486_v10 = vadd.f32 %v1939_v35, %v2039_v7 }
 0x295   : > { %v876_v11 = vpop.f32.mrf.mxu1 }
 0x296   : > { %v939_v36 = vadd.f32 %v876_v11, %v422_v12  ;;  %v957_v20 = vmax.f32 %v941_v15, 0.0 }
 0x297   : > { %v1585_v16 = vpop.f32.mrf.mxu1 }
 0x298   : > { %v942_v19 = vadd.f32 %v1585_v16, %v436_v14  ;;  %v955_v24 = vmax.f32 %v939_v36, 0.0 }
 0x299   : > { %v879_v38 = vpop.f32.mrf.mxu1 }
 0x29a   : > { %v958_v21 = vmax.f32 %v942_v19, 0.0  ;;  %v940_v23 = vadd.f32 %v879_v38, %v426_v18 }
 0x29c   : > { %v972_v50 = vpack.c.bf16 %v958_v21, %v957_v20  ;;  %v956_v5 = vmax.f32 %v940_v23, 0.0 }
 0x29e   : > { %v971_v25 = vpack.c.bf16 %v956_v5, %v955_v24 }
 0x2a0   : > { %1614 = vmatprep.mubr.bf16.mxu0 %v971_v25 }
 0x2a1   : > { %1615 = vmatmul.mubr.bf16.vlgmr.msra.gmra.mxu0 %v972_v50 }
 0x2a4   : > { %v1588_v41 = vpop.f32.mrf.mxu1 }
 0x2a5   : > { %v945_v29 = vadd.f32 %v1588_v41, %v452_v54 }
 0x2a6   : > { %v892_v27 = vpop.f32.mrf.mxu1 }
 0x2a7   : > { %v943_v33 = vadd.f32 %v892_v27, %v442_v45  ;;  %v961_v40 = vmax.f32 %v945_v29, 0.0 }
 0x2a8   : > { %v1589_v30 = vpop.f32.mrf.mxu1 }
 0x2a9   : > { %v946_v34 = vadd.f32 %v1589_v30, %v456_v28  ;;  %v959_v46 = vmax.f32 %v943_v33, 0.0 }
 0x2aa   : > { %v895_v37 = vpop.f32.mrf.mxu1 }
 0x2ab   : > { %v962_v42 = vmax.f32 %v946_v34, 0.0  ;;  %v944_v43 = vadd.f32 %v895_v37, %v446_v32 }
 0x2ad   : > { %v974_v4 = vpack.c.bf16 %v962_v42, %v961_v40  ;;  %v960_v47 = vmax.f32 %v944_v43, 0.0 }
 0x2af   : > { %v973_v48 = vpack.c.bf16 %v960_v47, %v959_v46 }
 0x2b1   : > { %1618 = vmatprep.mubr.bf16.mxu0 %v973_v48 }
 0x2b2   : > { %1619 = vmatmul.mubr.bf16.gmra.mxu0 %v974_v4 }
 0x2b5   : > { %v1592_v59 = vpop.f32.mrf.mxu1 }
 0x2b6   : > { %v949_v52 = vadd.f32 %v1592_v59, %v472_v8 }
 0x2b7   : > { %v908_v49 = vpop.f32.mrf.mxu1 }
 0x2b8   : > { %v947_v39 = vadd.f32 %v908_v49, %v462_v63  ;;  %v965_v58 = vmax.f32 %v949_v52, 0.0 }
 0x2b9   : > { %v1593_v53 = vpop.f32.mrf.mxu1 }
 0x2ba   : > { %v950_v56 = vadd.f32 %v1593_v53, %v476_v51  ;;  %v963_v62 = vmax.f32 %v947_v39, 0.0 }
 0x2bb   : > { %v911_v57 = vpop.f32.mrf.mxu1 }
 0x2bc   : > { %v966_v60 = vmax.f32 %v950_v56, 0.0  ;;  %v948_v61 = vadd.f32 %v911_v57, %v466_v55 }
 0x2be   : > { %v976_v22 = vpack.c.bf16 %v966_v60, %v965_v58  ;;  %v964_v0 = vmax.f32 %v948_v61, 0.0 }
 0x2c0   : > { %v975_v1 = vpack.c.bf16 %v964_v0, %v963_v62 }
 0x2c2   : > { %1622 = vmatprep.mubr.bf16.mxu0 %v975_v1 }
 0x2c3   : > { %1623 = vmatmul.mubr.bf16.gmra.mxu0 %v976_v22 }
 0x2c4   : > { %v1596_v2 = vpop.f32.mrf.mxu1 }
 0x2c5   : > { %v953_v14 = vadd.f32 %v1596_v2, %v492_v6 }
 0x2c6   : > { %v924_v26 = vpop.f32.mrf.mxu1 }
 0x2c7   : > { %v951_v11 = vadd.f32 %v924_v26, %v482_v3  ;;  %v969_v38 = vmax.f32 %v953_v14, 0.0 }
 0x2c8   : > { %v1597_v9 = vpop.f32.mrf.mxu1 }
 0x2c9   : > { %v954_v12 = vadd.f32 %v1597_v9, %v496_v17  ;;  %v967_v36 = vmax.f32 %v951_v11, 0.0 }
 0x2ca   : > { %v927_v15 = vpop.f32.mrf.mxu1 }
 0x2cb   : > { %v952_v16 = vadd.f32 %v927_v15, %v486_v10  ;;  %v970_v18 = vmax.f32 %v954_v12, 0.0 }
 0x2cd   : > { %v968_v19 = vmax.f32 %v952_v16, 0.0  ;;  %v978_v31 = vpack.c.bf16 %v970_v18, %v969_v38 }
 0x2cf   : > { %v977_v20 = vpack.c.bf16 %v968_v19, %v967_v36 }
 0x2d1   : > { %1626 = vmatprep.mubr.bf16.mxu0 %v977_v20 }
 0x2d2   : > { %1627 = vmatmul.mubr.bf16.gmra.mxu0 %v978_v31 }
 0x361   : > { %v1616_v21 = vpop.f32.mrf.mxu0 }
 0x362   : > { %v1093_v35 = vadd.f32 %v1616_v21, %v2075_v44 }
 0x363   : > { %v1084_v7 = vpop.f32.mrf.mxu0 }
 0x364   : > { %1730 = vtanh.f32 %v1093_v35  ;;  %v1085_v23 = vadd.f32 %v2075_v44, %v1084_v7 }
 0x365   : > { %v1617_v24 = vpop.f32.mrf.mxu0 }
 0x366   : > { %1732 = vtanh.f32 %v1085_v23  ;;  %v1096_v50 = vadd.f32 %v1617_v24, %v2075_v44 }
 0x367   : > { %v1087_v5 = vpop.f32.mrf.mxu0 }
 0x368   : > { %1734 = vtanh.f32 %v1096_v50  ;;  %v1088_v25 = vadd.f32 %v2075_v44, %v1087_v5 }
 0x36a   : > { %1736 = vtanh.f32 %v1088_v25 }
 0x371   : > { %v1731_v41 = vpop.eup %1730 }
 0x372   : > { %v1472_v54 = vpack.c.bf16 %v1731_v41, %v1731_v41  ;;  %v1620_v27 = vpop.f32.mrf.mxu0 }
 0x373   : > { %v1733_v45 = vpop.eup %1732  ;;  %v1109_v28 = vadd.f32 %v1620_v27, %v2075_v44 }
 0x374   : > { %1301 = vst [vmem:[%s2004_s26 + $0x14] sm:$0xf] %v1472_v54  ;;  %v1470_v29 = vpack.c.bf16 %v1733_v45, %v1733_v45  ;;  %v1100_v30 = vpop.f32.mrf.mxu0 }
 0x375   : > { %v1735_v32 = vpop.eup %1734  ;;  %1738 = vtanh.f32 %v1109_v28  ;;  %v1101_v33 = vadd.f32 %v2075_v44, %v1100_v30 }
 0x376   : > { %1299 = vst [vmem:[%s2004_s26 + $0x4] sm:$0xf] %v1470_v29  ;;  %v1473_v34 = vpack.c.bf16 %v1735_v32, %v1735_v32  ;;  %v1621_v37 = vpop.f32.mrf.mxu0 }
 0x377   : > { %v1737_v40 = vpop.eup %1736  ;;  %1740 = vtanh.f32 %v1101_v33  ;;  %v1112_v42 = vadd.f32 %v1621_v37, %v2075_v44 }
 0x378   : > { %1302 = vst [vmem:[%s2004_s26 + $0x1c] sm:$0xf] %v1473_v34  ;;  %v1471_v43 = vpack.c.bf16 %v1737_v40, %v1737_v40  ;;  %v1103_v46 = vpop.f32.mrf.mxu0 }
 0x379   : > { %1742 = vtanh.f32 %v1112_v42  ;;  %v1104_v4 = vadd.f32 %v2075_v44, %v1103_v46 }
 0x37a   : > { %1300 = vst [vmem:[%s2004_s26 + $0xc] sm:$0xf] %v1471_v43 }
 0x37b   : > { %1744 = vtanh.f32 %v1104_v4 }
 0x382   : > { %v1739_v47 = vpop.eup %1738 }
 0x383   : > { %v1476_v48 = vpack.c.bf16 %v1739_v47, %v1739_v47  ;;  %v1624_v59 = vpop.f32.mrf.mxu0 }
 0x384   : > { %v1741_v8 = vpop.eup %1740  ;;  %v1125_v49 = vadd.f32 %v1624_v59, %v2075_v44 }
 0x385   : > { %1305 = vst [vmem:[%s2004_s26 + $0x34] sm:$0xf] %v1476_v48  ;;  %v1474_v63 = vpack.c.bf16 %v1741_v8, %v1741_v8  ;;  %v1116_v51 = vpop.f32.mrf.mxu0 }
 0x386   : > { %v1743_v52 = vpop.eup %1742  ;;  %1746 = vtanh.f32 %v1125_v49  ;;  %v1117_v53 = vadd.f32 %v2075_v44, %v1116_v51 }
 0x387   : > { %1303 = vst [vmem:[%s2004_s26 + $0x24] sm:$0xf] %v1474_v63  ;;  %v1477_v55 = vpack.c.bf16 %v1743_v52, %v1743_v52  ;;  %v1625_v39 = vpop.f32.mrf.mxu0 }
 0x388   : > { %v1745_v56 = vpop.eup %1744  ;;  %1748 = vtanh.f32 %v1117_v53  ;;  %v1128_v57 = vadd.f32 %v1625_v39, %v2075_v44 }
 0x389   : > { %1306 = vst [vmem:[%s2004_s26 + $0x3c] sm:$0xf] %v1477_v55  ;;  %v1475_v58 = vpack.c.bf16 %v1745_v56, %v1745_v56  ;;  %v1119_v60 = vpop.f32.mrf.mxu0 }
 0x38a   : > { %1750 = vtanh.f32 %v1128_v57  ;;  %v1120_v61 = vadd.f32 %v2075_v44, %v1119_v60 }
 0x38b   : > { %1304 = vst [vmem:[%s2004_s26 + $0x2c] sm:$0xf] %v1475_v58 }
 0x38c   : > { %1752 = vtanh.f32 %v1120_v61 }
 0x392   : > { %v1628_v62 = vpop.f32.mrf.mxu0 }
 0x393   : > { %v1747_v22 = vpop.eup %1746  ;;  %v1141_v0 = vadd.f32 %v1628_v62, %v2075_v44 }
 0x394   : > { %v1480_v1 = vpack.c.bf16 %v1747_v22, %v1747_v22  ;;  %v1132_v13 = vpop.f32.mrf.mxu0 }
 0x395   : > { %v1749_v2 = vpop.eup %1748  ;;  %1754 = vtanh.f32 %v1141_v0  ;;  %v1133_v26 = vadd.f32 %v2075_v44, %v1132_v13 }
 0x396   : > { %1309 = vst [vmem:[%s2004_s26 + $0x54] sm:$0xf] %v1480_v1  ;;  %v1478_v3 = vpack.c.bf16 %v1749_v2, %v1749_v2  ;;  %v1629_v17 = vpop.f32.mrf.mxu0 }
 0x397   : > { %v1751_v6 = vpop.eup %1750  ;;  %1756 = vtanh.f32 %v1133_v26  ;;  %v1144_v9 = vadd.f32 %v1629_v17, %v2075_v44 }
 0x398   : > { %1307 = vst [vmem:[%s2004_s26 + $0x44] sm:$0xf] %v1478_v3  ;;  %v1481_v10 = vpack.c.bf16 %v1751_v6, %v1751_v6  ;;  %v1135_v11 = vpop.f32.mrf.mxu0 }
 0x399   : > { %v1753_v12 = vpop.eup %1752  ;;  %1758 = vtanh.f32 %v1144_v9  ;;  %v1136_v14 = vadd.f32 %v2075_v44, %v1135_v11 }
 0x39a   : > { %1310 = vst [vmem:[%s2004_s26 + $0x5c] sm:$0xf] %v1481_v10  ;;  %v1479_v15 = vpack.c.bf16 %v1753_v12, %v1753_v12 }
 0x39b   : > { %1760 = vtanh.f32 %v1136_v14 }
 0x39c   : > { %1308 = vst [vmem:[%s2004_s26 + $0x4c] sm:$0xf] %v1479_v15 }
 0x3a2   : > { %v1755_v16 = vpop.eup %1754 }
 0x3a3   : > { %v1484_v18 = vpack.c.bf16 %v1755_v16, %v1755_v16 }
 0x3a4   : > { %v1757_v36 = vpop.eup %1756 }
 0x3a5   : > { %1313 = vst [vmem:[%s2004_s26 + $0x74] sm:$0xf] %v1484_v18  ;;  %v1482_v19 = vpack.c.bf16 %v1757_v36, %v1757_v36 }
 0x3a6   : > { %v1759_v38 = vpop.eup %1758 }
 0x3a7   : > { %1311 = vst [vmem:[%s2004_s26 + $0x64] sm:$0xf] %v1482_v19  ;;  %v1485_v20 = vpack.c.bf16 %v1759_v38, %v1759_v38 }
 0x3a8   : > { %v1761_v31 = vpop.eup %1760 }
 0x3a9   : > { %1314 = vst [vmem:[%s2004_s26 + $0x7c] sm:$0xf] %v1485_v20  ;;  %v1483_v21 = vpack.c.bf16 %v1761_v31, %v1761_v31 }
 0x3ab   : > { %1312 = vst [vmem:[%s2004_s26 + $0x6c] sm:$0xf] %v1483_v21 }
 0x3ac PF: > { %s18_s27 = sadd.s32 1, %s1768_s27  }
 0x3ad   : > { %p15_p4 = scmp.ge.s32.totalorder %s18_s27, 4  }
 0x3af   :  { %17 = sbr.rel (!%p15_p4) target bundleno = 1 (0x1), region = 82 }

</bundles_post_ra>
